<compile_context>
chip_gen: v7x
topology: tpu7x:2x2x1
jax: 0.10.0
libtpu: 0.0.40
codegen_flags: <defaults>
</compile_context>

<pallas_src>
import functools

import numpy as np
import jax
import jax.numpy as jnp
from jax import lax
from jax.experimental import pallas as pl
from jax.experimental.pallas import tpu as pltpu

_BN_EPS = 1e-5
_LANE = 128
_SUBLANE = 8
# Folded weights must stay VMEM-resident (constant index maps); keep well under the
# smallest per-core VMEM budget (v7x: 64 MiB per TensorCore).
_MAX_RESIDENT_WEIGHT_BYTES = 24 * 1024 * 1024


# ----------------------------------------------------------------------------
# Architecture schedule (mirror of Generator.build_layers)
# ----------------------------------------------------------------------------
def _build_layer_dims(side, num_channels):
    layer_dims = [(1, side), (num_channels, side // 2)]
    while layer_dims[-1][1] > 3 and len(layer_dims) < 4:
        layer_dims.append((layer_dims[-1][0] * 2, layer_dims[-1][1] // 2))
    return layer_dims


def _round_up(x, m):
    return ((x + m - 1) // m) * m


def _cdiv(a, b):
    return -(-a // b)


# ----------------------------------------------------------------------------
# ConvTranspose2d -> dense matrix folding (host-side, done once per weight set)
# ----------------------------------------------------------------------------
def _convt_matrix(w_np, H, W, stride, padding):
    """Dense M such that flat_out = flat_in @ M for PyTorch ConvTranspose2d.

    w_np: (Cin, Cout, K, K) PyTorch layout; flat layout is channel-major (c*H + y)*W + x.
    """
    Cin, Cout, K, _ = w_np.shape
    Hout = (H - 1) * stride - 2 * padding + K
    Wout = (W - 1) * stride - 2 * padding + K
    M = np.zeros((Cin * H * W, Cout * Hout * Wout), dtype=np.float32)
    for ci in range(Cin):
        for iy in range(H):
            for ix in range(W):
                row = (ci * H + iy) * W + ix
                for co in range(Cout):
                    for ky in range(K):
                        oy = iy * stride - padding + ky
                        if not (0 <= oy < Hout):
                            continue
                        for kx in range(K):
                            ox = ix * stride - padding + kx
                            if not (0 <= ox < Wout):
                                continue
                            col = (co * Hout + oy) * Wout + ox
                            M[row, col] += w_np[ci, co, ky, kx]
    return M, Hout, Wout


def init_generator_params(key, side, rand_dim, num_channels, dtype=jnp.float32):
    """Deterministic parameters matching the PyTorch layer shapes."""
    layer_dims = _build_layer_dims(side, num_channels)
    c_last, k_last = layer_dims[-1]

    params = []
    key, kw = jax.random.split(key)
    w0 = 0.1 * jax.random.normal(kw, (rand_dim, c_last, k_last, k_last), dtype)
    params.append({"w": w0, "b": None, "bn": None})

    for prev, curr in zip(reversed(layer_dims), reversed(layer_dims[:-1])):
        cin, cout = prev[0], curr[0]
        key, kw, kb, kg, kbe, km, kv = jax.random.split(key, 7)
        w = 0.1 * jax.random.normal(kw, (cin, cout, 4, 4), dtype)
        b = 0.1 * jax.random.normal(kb, (cout,), dtype)
        gamma = 1.0 + 0.2 * jax.random.normal(kg, (cin,), dtype)
        beta = 0.1 * jax.random.normal(kbe, (cin,), dtype)
        mean = 0.1 * jax.random.normal(km, (cin,), dtype)
        var = jax.random.uniform(kv, (cin,), dtype, 0.5, 1.5)
        params.append({"w": w, "b": b, "bn": (gamma, beta, mean, var)})
    return params, layer_dims


def fold_params_for_kernel(params, layer_dims, eps=_BN_EPS, compute_dtype=jnp.float32):
    """Fold ConvTranspose2d weights into dense matrices and BN into the preceding matmul.

    Returns (flat_params, out_chw, in_feat_pad) with flat_params = (M0, b0, M1, b1, ...),
    all feature dims zero-padded to multiples of 128 (lane-dense).
    compute_dtype: dtype of the matrices fed to the MXU (jnp.bfloat16 recommended on v5e;
    biases stay float32; loosen comparison tolerances if bf16 is used).
    """
    c_last, _ = layer_dims[-1]

    w0 = np.asarray(params[0]["w"], np.float32)          # (rand_dim, c_last, K, K), 1x1 input
    M0, H, W = _convt_matrix(w0, 1, 1, stride=1, padding=0)
    C = c_last
    mats = [M0]
    biases = [np.zeros((M0.shape[1],), np.float32)]      # ConvT0 has bias=False

    for p in params[1:]:
        # Fold this block's BN (y = x*scale + shift, eval mode) into the previous matmul.
        gamma, beta, mean, var = [np.asarray(a, np.float32) for a in p["bn"]]
        scale_c = gamma / np.sqrt(var + eps)
        shift_c = beta - mean * scale_c
        scale = np.repeat(scale_c, H * W)                # channel-major over prev features
        shift = np.repeat(shift_c, H * W)
        mats[-1] = mats[-1] * scale[None, :]
        biases[-1] = biases[-1] * scale + shift

        # This block's ConvTranspose2d(stride=2, pad=1) as a dense matrix.
        w_np = np.asarray(p["w"], np.float32)            # (C, Cout, 4, 4)
        M, Hout, Wout = _convt_matrix(w_np, H, W, stride=2, padding=1)
        mats.append(M)
        biases.append(np.repeat(np.asarray(p["b"], np.float32), Hout * Wout))
        C, H, W = w_np.shape[1], Hout, Wout

    # Zero-pad every feature dim to a multiple of 128 (lane-dense layouts, no masked vst).
    flat = []
    in_feat_pad = _round_up(mats[0].shape[0], _LANE)
    prev_pad = in_feat_pad
    total_weight_bytes = 0
    for M, b in zip(mats, biases):
        rows, cols = M.shape
        cpad = _round_up(cols, _LANE)
        Mp = np.zeros((prev_pad, cpad), np.float32)
        Mp[:rows, :cols] = M
        bp = np.zeros((1, cpad), np.float32)
        bp[0, :cols] = b
        flat.append(jnp.asarray(Mp, compute_dtype))
        flat.append(jnp.asarray(bp, jnp.float32))
        total_weight_bytes += Mp.size * jnp.dtype(compute_dtype).itemsize + bp.size * 4
        prev_pad = cpad

    if total_weight_bytes > _MAX_RESIDENT_WEIGHT_BYTES:
        # TODO(synk): for large `side` the folded matrices grow ~quadratically; tile the
        # biggest matmul over its output-feature dim (second grid axis / emit_pipeline)
        # instead of keeping it fully VMEM-resident.
        raise NotImplementedError(
            f"folded weights ({total_weight_bytes} B) exceed the VMEM-residency budget "
            f"({_MAX_RESIDENT_WEIGHT_BYTES} B)")

    return tuple(flat), (C, H, W), in_feat_pad


# ----------------------------------------------------------------------------
# Pallas kernel
# ----------------------------------------------------------------------------
def _make_kernel(n_stages):
    """One batch tile: chain of MXU matmuls with ReLU between stages (BN pre-folded)."""

    def kernel(*refs):
        x_ref = refs[0]
        w_refs = refs[1:1 + 2 * n_stages]
        out_ref = refs[1 + 2 * n_stages]

        h = x_ref[...].astype(jnp.float32)
        for l in range(n_stages):
            m_ref = w_refs[2 * l]
            b_ref = w_refs[2 * l + 1]
            if l > 0:
                h = jnp.maximum(h, jnp.float32(0.0))      # ReLU (BN already folded)
            h = jnp.dot(h.astype(m_ref.dtype), m_ref[...],
                        preferred_element_type=jnp.float32) + b_ref[...]
        out_ref[...] = h.astype(out_ref.dtype)

    return kernel


@functools.partial(jax.jit, static_argnames=("tb", "n_stages"))
def _generator_pallas(x_flat, flat_params, tb, n_stages):
    batch, in_feat = x_flat.shape
    out_feat = flat_params[-1].shape[1]
    grid = (batch // tb,)

    in_specs = [pl.BlockSpec((tb, in_feat), lambda i: (i, 0))]
    # Weights / biases: full blocks with constant index maps -> fetched once and kept
    # VMEM-resident across all grid steps.  (pl.Buffered(1) pipeline_mode would halve
    # their buffering; left at the default for portability — they total <1 MiB here.)
    in_specs += [pl.BlockSpec(p.shape, lambda i: (0, 0)) for p in flat_params]
    out_spec = pl.BlockSpec((tb, out_feat), lambda i: (i, 0))

    mats = [flat_params[2 * l] for l in range(n_stages)]
    flops = 2 * batch * sum(int(m.shape[0]) * int(m.shape[1]) for m in mats)
    weight_bytes = sum(int(p.size) * p.dtype.itemsize for p in flat_params)
    bytes_accessed = (x_flat.size * x_flat.dtype.itemsize + weight_bytes
                      + batch * out_feat * x_flat.dtype.itemsize)

    # Explicit scoped-VMEM budget: resident weights + double-buffered x/out tiles +
    # live intermediates, with 2x slack (v5e's default scoped limit is only 16 MiB).
    max_feat = max(int(m.shape[1]) for m in mats)
    est = (weight_bytes
           + 2 * tb * (in_feat + out_feat) * 4
           + 4 * tb * max_feat * 4)
    vmem_limit = int(min(max(2 * est, 32 * 1024 * 1024), 64 * 1024 * 1024))

    return pl.pallas_call(
        _make_kernel(n_stages),
        out_shape=jax.ShapeDtypeStruct((batch, out_feat), x_flat.dtype),
        grid=grid,
        in_specs=in_specs,
        out_specs=out_spec,
        compiler_params=pltpu.CompilerParams(
            # TODO(synk): on v7x, pltpu.CORE_PARALLEL on the batch axis would split grid
            # steps across the two TensorCores; "parallel" kept for cross-gen safety.
            dimension_semantics=("parallel",),
            vmem_limit_bytes=vmem_limit,
        ),
        cost_estimate=pl.CostEstimate(
            flops=flops, transcendentals=0, bytes_accessed=bytes_accessed),
    )(x_flat, *flat_params)


def generator_forward(x_latent, flat_params, out_chw, in_feat_pad, *, tile_batch=1024):
    """Full Generator forward.  x_latent: (B, rand_dim, 1, 1) or (B, rand_dim)."""
    x_flat = x_latent.reshape(x_latent.shape[0], -1)
    batch, rand_dim = x_flat.shape
    n_stages = len(flat_params) // 2

    # Batch tile: multiple of 8 sublanes, derived from the number of grid steps so the
    # padded fraction stays small (e.g. batch=520 -> one tile of 520, not 2x512).
    tile_batch = max(_SUBLANE, _round_up(tile_batch, _SUBLANE))
    n_steps = max(1, _cdiv(batch, tile_batch))
    tb = _round_up(_cdiv(batch, n_steps), _SUBLANE)
    padded = _round_up(batch, tb)

    # Zero-pad batch rows and the latent width up to the lane-dense kernel input width.
    x_flat = jnp.pad(x_flat.astype(jnp.float32),
                     ((0, padded - batch), (0, in_feat_pad - rand_dim)))

    out_flat = _generator_pallas(x_flat, flat_params, tb=tb, n_stages=n_stages)
    c, h, w = out_chw
    return out_flat[:batch, :c * h * w].reshape(batch, c, h, w)


# ----------------------------------------------------------------------------
# Pure-JAX reference (independent implementation via lax.conv_general_dilated)
# ----------------------------------------------------------------------------
def _conv_transpose_ref(x, w, stride, padding, bias=None):
    """PyTorch-semantics ConvTranspose2d. x: (B,Cin,H,W); w: (Cin,Cout,K,K)."""
    K = w.shape[2]
    kern = jnp.flip(w, axis=(2, 3)).transpose(1, 0, 2, 3)   # (Cout, Cin, K, K)
    pad = K - 1 - padding
    out = lax.conv_general_dilated(
        x, kern, window_strides=(1, 1),
        padding=[(pad, pad), (pad, pad)],
        lhs_dilation=(stride, stride),
        dimension_numbers=("NCHW", "OIHW", "NCHW"))
    if bias is not None:
        out = out + bias[None, :, None, None]
    return out


def reference_forward(x_img, params, eps=_BN_EPS):
    h = _conv_transpose_ref(x_img, params[0]["w"], stride=1, padding=0, bias=None)
    for p in params[1:]:
        gamma, beta, mean, var = p["bn"]
        h = (h - mean[None, :, None, None]) * (
            gamma[None, :, None, None] / jnp.sqrt(var[None, :, None, None] + eps)
        ) + beta[None, :, None, None]
        h = jnp.maximum(h, 0.0)
        h = _conv_transpose_ref(h, p["w"], stride=2, padding=1, bias=p["b"])
    return h


if __name__ == "__main__":
    # Small shapes consistent with the module: side=16, rand_dim=32, num_channels=4
    # -> layer_dims = [(1,16),(4,8),(8,4),(16,2)]; output (B, 1, 16, 16).
    side, rand_dim, num_channels = 16, 32, 4
    batch = 8

    key = jax.random.PRNGKey(0)
    key, kx = jax.random.split(key)
    x = jax.random.normal(kx, (batch, rand_dim, 1, 1), jnp.float32)

    params, layer_dims = init_generator_params(key, side, rand_dim, num_channels)
    flat_params, out_chw, in_feat_pad = fold_params_for_kernel(params, layer_dims)

    out = generator_forward(x, flat_params, out_chw, in_feat_pad)
    out = jax.block_until_ready(out)

    ref = reference_forward(x, params)
    assert out.shape == (batch, 1, side, side), out.shape
    max_err = float(jnp.max(jnp.abs(out - ref)))
    assert jnp.allclose(out, ref, atol=1e-4, rtol=1e-4), max_err

    print("KERNEL_OK")
</pallas_src>

<mosaic_0001>
module attributes {stable_mosaic.version = 11 : i64} {
  func.func @kernel(%arg0: i32, %arg1: memref<8x128xf32, #tpu.memory_space<vmem>>, %arg2: memref<128x128xf32, #tpu.memory_space<vmem>>, %arg3: memref<1x128xf32, #tpu.memory_space<vmem>>, %arg4: memref<128x128xf32, #tpu.memory_space<vmem>>, %arg5: memref<1x128xf32, #tpu.memory_space<vmem>>, %arg6: memref<128x256xf32, #tpu.memory_space<vmem>>, %arg7: memref<1x256xf32, #tpu.memory_space<vmem>>, %arg8: memref<256x256xf32, #tpu.memory_space<vmem>>, %arg9: memref<1x256xf32, #tpu.memory_space<vmem>>, %arg10: memref<8x256xf32, #tpu.memory_space<vmem>>) attributes {dimension_semantics = [#tpu.dimension_semantics<parallel>], iteration_bounds = array<i64: 1>, scalar_prefetch = 0 : i64, scratch_operands = 0 : i64, tpu.core_type = #tpu.core_type<tc>, window_params = [{transform_indices = @transform_0, window_bounds = array<i64: 8, 128>}, {pipeline_mode = #tpu.pipeline_mode<synchronous>, transform_indices = @transform_1, window_bounds = array<i64: 128, 128>}, {pipeline_mode = #tpu.pipeline_mode<synchronous>, transform_indices = @transform_2, window_bounds = array<i64: 1, 128>}, {pipeline_mode = #tpu.pipeline_mode<synchronous>, transform_indices = @transform_3, window_bounds = array<i64: 128, 128>}, {pipeline_mode = #tpu.pipeline_mode<synchronous>, transform_indices = @transform_4, window_bounds = array<i64: 1, 128>}, {pipeline_mode = #tpu.pipeline_mode<synchronous>, transform_indices = @transform_5, window_bounds = array<i64: 128, 256>}, {pipeline_mode = #tpu.pipeline_mode<synchronous>, transform_indices = @transform_6, window_bounds = array<i64: 1, 256>}, {pipeline_mode = #tpu.pipeline_mode<synchronous>, transform_indices = @transform_7, window_bounds = array<i64: 256, 256>}, {pipeline_mode = #tpu.pipeline_mode<synchronous>, transform_indices = @transform_8, window_bounds = array<i64: 1, 256>}, {transform_indices = @transform_9, window_bounds = array<i64: 8, 256>}]} {
    %c0 = arith.constant 0 : index
    %c0_0 = arith.constant 0 : index
    %0 = vector.load %arg1[%c0, %c0_0] : memref<8x128xf32, #tpu.memory_space<vmem>>, vector<8x128xf32>
    %c0_1 = arith.constant 0 : index
    %c0_2 = arith.constant 0 : index
    %1 = vector.load %arg2[%c0_1, %c0_2] : memref<128x128xf32, #tpu.memory_space<vmem>>, vector<128x128xf32>
    %cst = arith.constant dense<0.000000e+00> : vector<8x128xf32>
    %2 = tpu.matmul %0, %1, %cst {dimension_numbers = #tpu.dot_dimension_numbers<[1], [0], [0], [1], [0, 0, 1, 1], [], []>} : vector<8x128xf32>, vector<128x128xf32>, vector<8x128xf32> -> vector<8x128xf32>
    %c0_3 = arith.constant 0 : index
    %c0_4 = arith.constant 0 : index
    %3 = vector.load %arg3[%c0_3, %c0_4] : memref<1x128xf32, #tpu.memory_space<vmem>>, vector<1x128xf32>
    %4 = vector.broadcast %3 : vector<1x128xf32> to vector<8x128xf32>
    %5 = arith.addf %2, %4 : vector<8x128xf32>
    %cst_5 = arith.constant 0.000000e+00 : f32
    %6 = vector.broadcast %cst_5 : f32 to vector<8x128xf32>
    %7 = arith.maximumf %5, %6 : vector<8x128xf32>
    %c0_6 = arith.constant 0 : index
    %c0_7 = arith.constant 0 : index
    %8 = vector.load %arg4[%c0_6, %c0_7] : memref<128x128xf32, #tpu.memory_space<vmem>>, vector<128x128xf32>
    %cst_8 = arith.constant dense<0.000000e+00> : vector<8x128xf32>
    %9 = tpu.matmul %7, %8, %cst_8 {dimension_numbers = #tpu.dot_dimension_numbers<[1], [0], [0], [1], [0, 0, 1, 1], [], []>} : vector<8x128xf32>, vector<128x128xf32>, vector<8x128xf32> -> vector<8x128xf32>
    %c0_9 = arith.constant 0 : index
    %c0_10 = arith.constant 0 : index
    %10 = vector.load %arg5[%c0_9, %c0_10] : memref<1x128xf32, #tpu.memory_space<vmem>>, vector<1x128xf32>
    %11 = vector.broadcast %10 : vector<1x128xf32> to vector<8x128xf32>
    %12 = arith.addf %9, %11 : vector<8x128xf32>
    %cst_11 = arith.constant 0.000000e+00 : f32
    %13 = vector.broadcast %cst_11 : f32 to vector<8x128xf32>
    %14 = arith.maximumf %12, %13 : vector<8x128xf32>
    %c0_12 = arith.constant 0 : index
    %c0_13 = arith.constant 0 : index
    %15 = vector.load %arg6[%c0_12, %c0_13] : memref<128x256xf32, #tpu.memory_space<vmem>>, vector<128x256xf32>
    %cst_14 = arith.constant dense<0.000000e+00> : vector<8x256xf32>
    %16 = tpu.matmul %14, %15, %cst_14 {dimension_numbers = #tpu.dot_dimension_numbers<[1], [0], [0], [1], [0, 0, 1, 1], [], []>} : vector<8x128xf32>, vector<128x256xf32>, vector<8x256xf32> -> vector<8x256xf32>
    %c0_15 = arith.constant 0 : index
    %c0_16 = arith.constant 0 : index
    %17 = vector.load %arg7[%c0_15, %c0_16] : memref<1x256xf32, #tpu.memory_space<vmem>>, vector<1x256xf32>
    %18 = vector.broadcast %17 : vector<1x256xf32> to vector<8x256xf32>
    %19 = arith.addf %16, %18 : vector<8x256xf32>
    %cst_17 = arith.constant 0.000000e+00 : f32
    %20 = vector.broadcast %cst_17 : f32 to vector<8x256xf32>
    %21 = arith.maximumf %19, %20 : vector<8x256xf32>
    %c0_18 = arith.constant 0 : index
    %c0_19 = arith.constant 0 : index
    %22 = vector.load %arg8[%c0_18, %c0_19] : memref<256x256xf32, #tpu.memory_space<vmem>>, vector<256x256xf32>
    %cst_20 = arith.constant dense<0.000000e+00> : vector<8x256xf32>
    %23 = tpu.matmul %21, %22, %cst_20 {dimension_numbers = #tpu.dot_dimension_numbers<[1], [0], [0], [1], [0, 0, 1, 1], [], []>} : vector<8x256xf32>, vector<256x256xf32>, vector<8x256xf32> -> vector<8x256xf32>
    %c0_21 = arith.constant 0 : index
    %c0_22 = arith.constant 0 : index
    %24 = vector.load %arg9[%c0_21, %c0_22] : memref<1x256xf32, #tpu.memory_space<vmem>>, vector<1x256xf32>
    %25 = vector.broadcast %24 : vector<1x256xf32> to vector<8x256xf32>
    %26 = arith.addf %23, %25 : vector<8x256xf32>
    %c0_23 = arith.constant 0 : index
    %c0_24 = arith.constant 0 : index
    %27 = vector.load %arg10[%c0_23, %c0_24] : memref<8x256xf32, #tpu.memory_space<vmem>>, vector<8x256xf32>
    tpu.vector_store %arg10[%c0_23, %c0_24], %26 {strides = array<i32>} : memref<8x256xf32, #tpu.memory_space<vmem>>, vector<8x256xf32>,
    return
  }
  func.func @transform_0(%arg0: i32) -> (i32, i32) {
    %c0_i32 = arith.constant 0 : i32
    %c0_i32_0 = arith.constant 0 : i32
    return %arg0, %c0_i32 : i32, i32
  }
  func.func @transform_1(%arg0: i32) -> (i32, i32) {
    %c0_i32 = arith.constant 0 : i32
    %c0_i32_0 = arith.constant 0 : i32
    %c0_i32_1 = arith.constant 0 : i32
    return %c0_i32, %c0_i32_0 : i32, i32
  }
  func.func @transform_2(%arg0: i32) -> (i32, i32) {
    %c0_i32 = arith.constant 0 : i32
    %c0_i32_0 = arith.constant 0 : i32
    %c0_i32_1 = arith.constant 0 : i32
    return %c0_i32, %c0_i32_0 : i32, i32
  }
  func.func @transform_3(%arg0: i32) -> (i32, i32) {
    %c0_i32 = arith.constant 0 : i32
    %c0_i32_0 = arith.constant 0 : i32
    %c0_i32_1 = arith.constant 0 : i32
    return %c0_i32, %c0_i32_0 : i32, i32
  }
  func.func @transform_4(%arg0: i32) -> (i32, i32) {
    %c0_i32 = arith.constant 0 : i32
    %c0_i32_0 = arith.constant 0 : i32
    %c0_i32_1 = arith.constant 0 : i32
    return %c0_i32, %c0_i32_0 : i32, i32
  }
  func.func @transform_5(%arg0: i32) -> (i32, i32) {
    %c0_i32 = arith.constant 0 : i32
    %c0_i32_0 = arith.constant 0 : i32
    %c0_i32_1 = arith.constant 0 : i32
    return %c0_i32, %c0_i32_0 : i32, i32
  }
  func.func @transform_6(%arg0: i32) -> (i32, i32) {
    %c0_i32 = arith.constant 0 : i32
    %c0_i32_0 = arith.constant 0 : i32
    %c0_i32_1 = arith.constant 0 : i32
    return %c0_i32, %c0_i32_0 : i32, i32
  }
  func.func @transform_7(%arg0: i32) -> (i32, i32) {
    %c0_i32 = arith.constant 0 : i32
    %c0_i32_0 = arith.constant 0 : i32
    %c0_i32_1 = arith.constant 0 : i32
    return %c0_i32, %c0_i32_0 : i32, i32
  }
  func.func @transform_8(%arg0: i32) -> (i32, i32) {
    %c0_i32 = arith.constant 0 : i32
    %c0_i32_0 = arith.constant 0 : i32
    %c0_i32_1 = arith.constant 0 : i32
    return %c0_i32, %c0_i32_0 : i32, i32
  }
  func.func @transform_9(%arg0: i32) -> (i32, i32) {
    %c0_i32 = arith.constant 0 : i32
    %c0_i32_0 = arith.constant 0 : i32
    return %arg0, %c0_i32 : i32, i32
  }
}

</mosaic_0001>

<bundles_post_ra>
// kernel: _generator_pallas.1
= control target key start
LH: loop header
LB: loop body
LE: loop exit
PB: predicated region body
PF: predicated region fallthrough
CT: control target
= control target key end

     0   :  { %14 = vsyncpa [#allocation3], 0  ;;  %s1159_s0 = inlined_call_operand.hbm [shape: f32[8,128], index: 0, kind: input, shape index: {}]   ;;  %s1160_s1 = inlined_call_operand.hbm [shape: f32[128,128], index: 1, kind: input, shape index: {}]   ;;  %s1161_s2 = inlined_call_operand.vmem [shape: f32[1,128], index: 2, kind: input, shape index: {}]   ;;  %s1162_s3 = inlined_call_operand.hbm [shape: f32[128,128], index: 3, kind: input, shape index: {}]   ;;  %s1163_s4 = inlined_call_operand.vmem [shape: f32[1,128], index: 4, kind: input, shape index: {}]   ;;  %s1164_s5 = inlined_call_operand.hbm [shape: f32[128,256], index: 5, kind: input, shape index: {}]   ;;  %s1165_s6 = inlined_call_operand.vmem [shape: f32[1,256], index: 6, kind: input, shape index: {}]   ;;  %s1166_s7 = inlined_call_operand.hbm [shape: f32[256,256], index: 7, kind: input, shape index: {}]   ;;  %s1167_s8 = inlined_call_operand.vmem [shape: f32[1,256], index: 8, kind: input, shape index: {}]   ;;  %s1168_s9 = inlined_call_operand.hbm [shape: f32[8,256], index: 9, kind: output, shape index: {}]  }
   0x1   :  { %15 = vsyncpa [#allocation6], 0 }
   0x2   :  { %16 = vsyncpa [#allocation9], 0 }
   0x3   :  { %17 = vsyncpa [#allocation4], 0  ;;  %s974_s30 = smov [#allocation5]   ;;  %s834_s13 = scalar_lea.hbm %s1160_s1, 2048 }
   0x4   :  { %s33_s10 = sshll.u32 %s974_s30, 4  ;;  %p835_p0 = scmp.ne.s32.totalorder %s1160_s1, %s834_s13  ;;  %s34_s10 = int_to_ptr.vmem [resolvable:$true] %s33_s10 }
   0x5   :  { %p838_p1 = scmp.lt.u32.totalorder %s834_s13, %s1160_s1 }
   0x7   :  { %p840_p2 = pnand %p838_p1, %p835_p0 }
   0x9   :  { %843 = shalt.err (!%p840_p2)
}
   0xa   :  { %s844_s18 = scalar_lea.vmem %s34_s10, 2048  ;;  %p849_p4 = scmp.lt.s32.totalorder %s34_s10, %s34_s10 }
   0xb   :  { %p845_p3 = scmp.ne.s32.totalorder %s34_s10, %s844_s18  ;;  %p850_p5 = scmp.lt.s32.totalorder %s844_s18, %s844_s18 }
   0xd   :  { %p851_p6 = por %p850_p5, %p849_p4 }
   0xf   :  { %p852_p7 = pnand %p851_p6, %p845_p3 }
  0x11   :  { %855 = shalt.err (!%p852_p7)
}
  0x12   :  { %s975_s19 = smov 128   ;;  %s976_s20 = smov 8  }
  0x13   :  { %39 = dma.hbm_to_vmem [thread:$0]  %s1160_s1, 2048, %s34_s10, [#allocation6], %s975_s19, %s975_s19, %s976_s20  }
  0x14   :  { %s977_s23 = smov [#allocation8]   ;;  %s856_s27 = scalar_lea.hbm %s1164_s5, 4096 }
  0x15   :  { %s61_s24 = sshll.u32 %s977_s23, 4  ;;  %p857_p8 = scmp.ne.s32.totalorder %s1164_s5, %s856_s27  ;;  %s62_s24 = int_to_ptr.vmem [resolvable:$true] %s61_s24 }
  0x16   :  { %p860_p9 = scmp.lt.u32.totalorder %s856_s27, %s1164_s5 }
  0x18   :  { %p862_p10 = pnand %p860_p9, %p857_p8 }
  0x1a   :  { %865 = shalt.err (!%p862_p10)
}
  0x1b   :  { %s866_s12 = scalar_lea.vmem %s62_s24, 4096  ;;  %p871_p12 = scmp.lt.s32.totalorder %s62_s24, %s62_s24 }
  0x1c   :  { %p867_p11 = scmp.ne.s32.totalorder %s62_s24, %s866_s12  ;;  %p872_p13 = scmp.lt.s32.totalorder %s866_s12, %s866_s12 }
  0x1e   :  { %p873_p0 = por %p872_p13, %p871_p12 }
  0x20   :  { %p874_p1 = pnand %p873_p0, %p867_p11 }
  0x22   :  { %877 = shalt.err (!%p874_p1)
}
  0x23   :  { %s978_s1 = smov 256   ;;  %s979_s10 = smov 16  }
  0x24   :  { %67 = dma.hbm_to_vmem [thread:$0]  %s1164_s5, 4096, %s62_s24, [#allocation9], %s978_s1, %s978_s1, %s979_s10  }
  0x25   :  { %s980_s15 = smov [#allocation2]   ;;  %s981_s17 = smov [#allocation7]  }
  0x26   :  { %s24_s16 = sshll.u32 %s980_s15, 4  ;;  %s47_s18 = sshll.u32 %s981_s17, 4  ;;  %s25_s16 = int_to_ptr.vmem [resolvable:$true] %s24_s16  ;;  %s1067_s18 = int_to_ptr.vmem [resolvable:$true] %s47_s18 }
  0x27   :  { %s878_s23 = scalar_lea.hbm %s1159_s0, 128 }
  0x28   :  { %p879_p2 = scmp.ne.s32.totalorder %s1159_s0, %s878_s23  ;;  %p882_p3 = scmp.lt.u32.totalorder %s878_s23, %s1159_s0 }
  0x2a   :  { %p884_p4 = pnand %p882_p3, %p879_p2 }
  0x2c   :  { %887 = shalt.err (!%p884_p4)
}
  0x2d   :  { %s888_s5 = scalar_lea.vmem %s25_s16, 128  ;;  %p893_p6 = scmp.lt.s32.totalorder %s25_s16, %s25_s16 }
  0x2e   :  { %p889_p5 = scmp.ne.s32.totalorder %s25_s16, %s888_s5  ;;  %p894_p7 = scmp.lt.s32.totalorder %s888_s5, %s888_s5 }
  0x30   :  { %p895_p8 = por %p894_p7, %p893_p6 }
  0x32   :  { %p896_p9 = pnand %p895_p8, %p889_p5 }
  0x34   :  { %899 = shalt.err (!%p896_p9)
}
  0x35   :  { %27 = dma.hbm_to_vmem [thread:$0]  %s1159_s0, 128, %s25_s16, [#allocation3]  }
  0x36   :  { %s900_s12 = scalar_lea.hbm %s1162_s3, 2048 }
  0x37   :  { %p901_p10 = scmp.ne.s32.totalorder %s1162_s3, %s900_s12  ;;  %p904_p11 = scmp.lt.u32.totalorder %s900_s12, %s1162_s3 }
  0x39   :  { %p906_p12 = pnand %p904_p11, %p901_p10 }
  0x3b   :  { %909 = shalt.err (!%p906_p12)
}
  0x3c   :  { %s910_s21 = scalar_lea.vmem %s1067_s18, 2048  ;;  %p915_p0 = scmp.lt.s32.totalorder %s1067_s18, %s1067_s18 }
  0x3d   :  { %p911_p13 = scmp.ne.s32.totalorder %s1067_s18, %s910_s21  ;;  %p916_p1 = scmp.lt.s32.totalorder %s910_s21, %s910_s21 }
  0x3f   :  { %p917_p2 = por %p916_p1, %p915_p0 }
  0x41   :  { %p918_p3 = pnand %p917_p2, %p911_p13 }
  0x43   :  { %921 = shalt.err (!%p918_p3)
}
  0x44   :  { %53 = dma.hbm_to_vmem [thread:$0]  %s1162_s3, 2048, %s1067_s18, [#allocation6], %s975_s19, %s975_s19, %s976_s20  }
  0x45   :  { %s982_s22 = smov [#allocation10]   ;;  %s922_s27 = scalar_lea.hbm %s1166_s7, 8192 }
  0x46   :  { %s75_s23 = sshll.u32 %s982_s22, 4  ;;  %p923_p4 = scmp.ne.s32.totalorder %s1166_s7, %s922_s27  ;;  %s76_s23 = int_to_ptr.vmem [resolvable:$true] %s75_s23 }
  0x47   :  { %p926_p5 = scmp.lt.u32.totalorder %s922_s27, %s1166_s7 }
  0x49   :  { %p928_p6 = pnand %p926_p5, %p923_p4 }
  0x4b   :  { %931 = shalt.err (!%p928_p6)
}
  0x4c   :  { %s932_s30 = scalar_lea.vmem %s76_s23, 8192  ;;  %p937_p8 = scmp.lt.s32.totalorder %s76_s23, %s76_s23 }
  0x4d   :  { %p933_p7 = scmp.ne.s32.totalorder %s76_s23, %s932_s30  ;;  %p938_p9 = scmp.lt.s32.totalorder %s932_s30, %s932_s30 }
  0x4f   :  { %p939_p10 = por %p938_p9, %p937_p8 }
  0x51   :  { %p940_p11 = pnand %p939_p10, %p933_p7 }
  0x53   :  { %943 = shalt.err (!%p940_p11)
}
  0x54   :  { %81 = dma.hbm_to_vmem [thread:$0]  %s1166_s7, 8192, %s76_s23, [#allocation9], %s978_s1, %s978_s1, %s979_s10  }
  0x55   :  { %966 = dma.done.wait [#allocation3], 128  }
  0x56   :  { %967 = vsyncadd [#allocation3], 4294967168 }
  0x57   :  { %968 = dma.done.wait [#allocation6], 4096  }
  0x58   :  { %969 = vsyncadd [#allocation6], 4294963200 }
  0x59   :  { %970 = dma.done.wait [#allocation9], 12288  }
  0x5a   :  { %971 = vsyncadd [#allocation9], 4294955008  ;;  %v983_v0 = vmov 0.0|0.0   ;;  %vm984_vm0 = vmmov 0   ;;  %v985_v1 = vmov 0.0   ;;  %v100_v2 = vld [vmem:[#allocation5] sm:$0xff] }
  0x5b   :  { %677 = vmatprep.subr.bf16.mxu0 %v983_v0  ;;  %639 = vmatprep.mubr.msk.f32.mxu0 %vm984_vm0, %v985_v1  ;;  %v101_v3 = vld [vmem:[#allocation5 + $0x8] sm:$0xff]  ;;  %v102_v4 = vld [vmem:[#allocation5 + $0x10] sm:$0xff]  ;;  %v103_v6 = vld [vmem:[#allocation5 + $0x18] sm:$0xff]  ;;  %s986_s12 = smov [#allocation11]  }
  0x5c   :  { %701 = vmatprep.subr.bf16.mxu1 %v983_v0  ;;  %674 = vmatprep.mubr.msk.f32.mxu1 %vm984_vm0, %v985_v1  ;;  %v678_v5 = vpack.c.bf16 %v101_v3, %v100_v2  ;;  %v681_v7 = vpack.c.bf16 %v103_v6, %v102_v4  ;;  %v104_v8 = vld [vmem:[#allocation5 + $0x20] sm:$0xff]  ;;  %v105_v9 = vld [vmem:[#allocation5 + $0x28] sm:$0xff]  ;;  %v196_v12 = vld [vmem:[#allocation7 + $0x10] sm:$0xff]  ;;  %s560_s13 = sshll.u32 %s986_s12, 4  ;;  %s561_s13 = int_to_ptr.vmem [resolvable:$true] %s560_s13 }
  0x5d   :  { %v194_v10 = vld [vmem:[#allocation7] sm:$0xff]  ;;  %v195_v11 = vld [vmem:[#allocation7 + $0x8] sm:$0xff]  ;;  %v197_v13 = vld [vmem:[#allocation7 + $0x18] sm:$0xff]  ;;  %v684_v14 = vpack.c.bf16 %v105_v9, %v104_v8  ;;  %p949_p13 = scmp.lt.s32.totalorder %s561_s13, %s561_s13 }
  0x5e   :  { %679 = vmatpush3.bf16.msra.mxu0 %v678_v5  ;;  %v702_v15 = vpack.c.bf16 %v195_v11, %v194_v10  ;;  %v106_v16 = vld [vmem:[#allocation5 + $0x30] sm:$0xff]  ;;  %v107_v17 = vld [vmem:[#allocation5 + $0x38] sm:$0xff]  ;;  %v705_v18 = vpack.c.bf16 %v197_v13, %v196_v12  ;;  %v198_v19 = vld [vmem:[#allocation7 + $0x20] sm:$0xff] }
  0x5f   :  { %680 = vmatprep.subr.bf16.mxu0 %v983_v0  ;;  %v199_v20 = vld [vmem:[#allocation7 + $0x28] sm:$0xff]  ;;  %v687_v21 = vpack.c.bf16 %v107_v17, %v106_v16  ;;  %v108_v22 = vld [vmem:[#allocation5 + $0x40] sm:$0xff]  ;;  %v200_v25 = vld [vmem:[#allocation7 + $0x30] sm:$0xff] }
  0x60   :  { %703 = vmatpush3.bf16.msra.mxu1 %v702_v15  ;;  %v109_v23 = vld [vmem:[#allocation5 + $0x48] sm:$0xff]  ;;  %v708_v24 = vpack.c.bf16 %v199_v20, %v198_v19  ;;  %v201_v26 = vld [vmem:[#allocation7 + $0x38] sm:$0xff]  ;;  %v110_v28 = vld [vmem:[#allocation5 + $0x50] sm:$0xff] }
  0x61   :  { %704 = vmatprep.subr.bf16.mxu1 %v983_v0  ;;  %v690_v27 = vpack.c.bf16 %v109_v23, %v108_v22  ;;  %v111_v29 = vld [vmem:[#allocation5 + $0x58] sm:$0xff]  ;;  %v711_v30 = vpack.c.bf16 %v201_v26, %v200_v25  ;;  %v202_v31 = vld [vmem:[#allocation7 + $0x40] sm:$0xff]  ;;  %v203_v32 = vld [vmem:[#allocation7 + $0x48] sm:$0xff] }
  0x62   :  { %682 = vmatpush3.bf16.msra.mxu0 %v681_v7  ;;  %v693_v33 = vpack.c.bf16 %v111_v29, %v110_v28  ;;  %v112_v34 = vld [vmem:[#allocation5 + $0x60] sm:$0xff]  ;;  %v113_v35 = vld [vmem:[#allocation5 + $0x68] sm:$0xff]  ;;  %v714_v36 = vpack.c.bf16 %v203_v32, %v202_v31  ;;  %v204_v37 = vld [vmem:[#allocation7 + $0x50] sm:$0xff] }
  0x63   :  { %683 = vmatprep.subr.bf16.mxu0 %v983_v0  ;;  %v205_v38 = vld [vmem:[#allocation7 + $0x58] sm:$0xff]  ;;  %v696_v39 = vpack.c.bf16 %v113_v35, %v112_v34  ;;  %v114_v40 = vld [vmem:[#allocation5 + $0x70] sm:$0xff]  ;;  %v206_v43 = vld [vmem:[#allocation7 + $0x60] sm:$0xff] }
  0x64   :  { %706 = vmatpush3.bf16.msra.mxu1 %v705_v18  ;;  %v115_v41 = vld [vmem:[#allocation5 + $0x78] sm:$0xff]  ;;  %v717_v42 = vpack.c.bf16 %v205_v38, %v204_v37  ;;  %v207_v44 = vld [vmem:[#allocation7 + $0x68] sm:$0xff]  ;;  %v208_v48 = vld [vmem:[#allocation7 + $0x70] sm:$0xff] }
  0x65   :  { %707 = vmatprep.subr.bf16.mxu1 %v983_v0  ;;  %v699_v45 = vpack.c.bf16 %v115_v41, %v114_v40  ;;  %v720_v46 = vpack.c.bf16 %v207_v44, %v206_v43  ;;  %v99_v47 = vld [vmem:[#allocation2] sm:$0xff]  ;;  %v289_v51 = vld [vmem:[#allocation8 + $0x8] sm:$0xff]  ;;  %v288_v53 = vld [vmem:[#allocation8] sm:$0xff] }
  0x66   :  { %685 = vmatpush3.bf16.msra.mxu0 %v684_v14  ;;  %v209_v49 = vld [vmem:[#allocation7 + $0x78] sm:$0xff]  ;;  %v290_v55 = vld [vmem:[#allocation8 + $0x10] sm:$0xff]  ;;  %v293_v56 = vld [vmem:[#allocation8 + $0x28] sm:$0xff] }
  0x67   :  { %686 = vmatprep.subr.bf16.mxu0 %v983_v0  ;;  %v723_v50 = vpack.c.bf16 %v209_v49, %v208_v48  ;;  %v291_v52 = vld [vmem:[#allocation8 + $0x18] sm:$0xff]  ;;  %v727_v58 = vpack.c.bf16 %v290_v55, %v288_v53  ;;  %v292_v60 = vld [vmem:[#allocation8 + $0x20] sm:$0xff]  ;;  %v294_v61 = vld [vmem:[#allocation8 + $0x30] sm:$0xff] }
  0x68   :  { %709 = vmatpush3.bf16.msra.mxu1 %v708_v24  ;;  %v725_v54 = vpack.c.bf16 %v291_v52, %v289_v51  ;;  %v295_v57 = vld [vmem:[#allocation8 + $0x38] sm:$0xff]  ;;  %v297_v62 = vld [vmem:[#allocation8 + $0x48] sm:$0xff]  ;;  %v296_v2 = vld [vmem:[#allocation8 + $0x40] sm:$0xff] }
  0x69   :  { %710 = vmatprep.subr.bf16.mxu1 %v983_v0  ;;  %v729_v59 = vpack.c.bf16 %v295_v57, %v293_v56  ;;  %v299_v63 = vld [vmem:[#allocation8 + $0x58] sm:$0xff]  ;;  %v298_v3 = vld [vmem:[#allocation8 + $0x50] sm:$0xff]  ;;  %v301_v4 = vld [vmem:[#allocation8 + $0x68] sm:$0xff] }
  0x6a   :  { %688 = vmatpush3.bf16.msra.mxu0 %v687_v21  ;;  %v303_v5 = vld [vmem:[#allocation8 + $0x78] sm:$0xff]  ;;  %v735_v6 = vpack.c.bf16 %v298_v3, %v296_v2  ;;  %v300_v8 = vld [vmem:[#allocation8 + $0x60] sm:$0xff]  ;;  %v302_v9 = vld [vmem:[#allocation8 + $0x70] sm:$0xff] }
  0x6b   :  { %689 = vmatprep.subr.bf16.mxu0 %v983_v0  ;;  %v737_v7 = vpack.c.bf16 %v303_v5, %v301_v4  ;;  %v305_v10 = vld [vmem:[#allocation8 + $0x88] sm:$0xff]  ;;  %v307_v11 = vld [vmem:[#allocation8 + $0x98] sm:$0xff]  ;;  %v739_v12 = vpack.c.bf16 %v302_v9, %v300_v8  ;;  %v304_v14 = vld [vmem:[#allocation8 + $0x80] sm:$0xff] }
  0x6c   :  { %712 = vmatpush3.bf16.msra.mxu1 %v711_v30  ;;  %v741_v13 = vpack.c.bf16 %v307_v11, %v305_v10  ;;  %v306_v15 = vld [vmem:[#allocation8 + $0x90] sm:$0xff]  ;;  %v309_v16 = vld [vmem:[#allocation8 + $0xa8] sm:$0xff]  ;;  %v311_v17 = vld [vmem:[#allocation8 + $0xb8] sm:$0xff] }
  0x6d   :  { %713 = vmatprep.subr.bf16.mxu1 %v983_v0  ;;  %v743_v18 = vpack.c.bf16 %v306_v15, %v304_v14  ;;  %v745_v19 = vpack.c.bf16 %v311_v17, %v309_v16  ;;  %v308_v20 = vld [vmem:[#allocation8 + $0xa0] sm:$0xff]  ;;  %v310_v21 = vld [vmem:[#allocation8 + $0xb0] sm:$0xff]  ;;  %v313_v22 = vld [vmem:[#allocation8 + $0xc8] sm:$0xff] }
  0x6e   :  { %691 = vmatpush3.bf16.msra.mxu0 %v690_v27  ;;  %v315_v23 = vld [vmem:[#allocation8 + $0xd8] sm:$0xff]  ;;  %v747_v24 = vpack.c.bf16 %v310_v21, %v308_v20  ;;  %v312_v26 = vld [vmem:[#allocation8 + $0xc0] sm:$0xff]  ;;  %v314_v27 = vld [vmem:[#allocation8 + $0xd0] sm:$0xff] }
  0x6f   :  { %692 = vmatprep.subr.bf16.mxu0 %v983_v0  ;;  %v749_v25 = vpack.c.bf16 %v315_v23, %v313_v22  ;;  %v751_v28 = vpack.c.bf16 %v314_v27, %v312_v26  ;;  %v571_v29 = vld [vmem:[%s1161_s2] ss:$0 sm:$0xff]  ;;  %v317_v34 = vld [vmem:[#allocation8 + $0xe8] sm:$0xff]  ;;  %v316_v37 = vld [vmem:[#allocation8 + $0xe0] sm:$0xff] }
  0x70   :  { %715 = vmatpush3.bf16.msra.mxu1 %v714_v36  ;;  %v319_v35 = vld [vmem:[#allocation8 + $0xf8] sm:$0xff]  ;;  %v318_v38 = vld [vmem:[#allocation8 + $0xf0] sm:$0xff]  ;;  %v406_v40 = vld [vmem:[#allocation10 + $0x8] sm:$0xff] }
  0x71   :  { %716 = vmatprep.subr.bf16.mxu1 %v983_v0  ;;  %v753_v36 = vpack.c.bf16 %v319_v35, %v317_v34  ;;  %v408_v41 = vld [vmem:[#allocation10 + $0x18] sm:$0xff]  ;;  %v407_v44 = vld [vmem:[#allocation10 + $0x10] sm:$0xff]  ;;  %v409_v49 = vld [vmem:[#allocation10 + $0x20] sm:$0xff] }
  0x72   :  { %694 = vmatpush3.bf16.msra.mxu0 %v693_v33  ;;  %v757_v43 = vpack.c.bf16 %v408_v41, %v406_v40  ;;  %v414_v51 = vld [vmem:[#allocation10 + $0x48] sm:$0xff]  ;;  %v416_v52 = vld [vmem:[#allocation10 + $0x58] sm:$0xff]  ;;  %v413_v55 = vld [vmem:[#allocation10 + $0x40] sm:$0xff] }
  0x73   :  { %695 = vmatprep.subr.bf16.mxu0 %v983_v0  ;;  %v415_v56 = vld [vmem:[#allocation10 + $0x50] sm:$0xff]  ;;  %v418_v57 = vld [vmem:[#allocation10 + $0x68] sm:$0xff]  ;;  %v421_v3 = vld [vmem:[#allocation10 + $0x80] sm:$0xff] }
  0x74   :  { %718 = vmatpush3.bf16.msra.mxu1 %v717_v42  ;;  %v405_v42 = vld [vmem:[#allocation10] sm:$0xff]  ;;  %v423_v4 = vld [vmem:[#allocation10 + $0x90] sm:$0xff]  ;;  %v426_v5 = vld [vmem:[#allocation10 + $0xa8] sm:$0xff] }
  0x75   :  { %719 = vmatprep.subr.bf16.mxu1 %v983_v0  ;;  %v425_v9 = vld [vmem:[#allocation10 + $0xa0] sm:$0xff]  ;;  %v427_v10 = vld [vmem:[#allocation10 + $0xb0] sm:$0xff]  ;;  %v430_v11 = vld [vmem:[#allocation10 + $0xc8] sm:$0xff] }
  0x76   :  { %697 = vmatpush3.bf16.msra.mxu0 %v696_v39  ;;  %v755_v39 = vpack.c.bf16 %v318_v38, %v316_v37  ;;  %v429_v15 = vld [vmem:[#allocation10 + $0xc0] sm:$0xff]  ;;  %v431_v16 = vld [vmem:[#allocation10 + $0xd0] sm:$0xff]  ;;  %v434_v17 = vld [vmem:[#allocation10 + $0xe8] sm:$0xff] }
  0x77   :  { %698 = vmatprep.subr.bf16.mxu0 %v983_v0  ;;  %v433_v21 = vld [vmem:[#allocation10 + $0xe0] sm:$0xff]  ;;  %v435_v22 = vld [vmem:[#allocation10 + $0xf0] sm:$0xff]  ;;  %v438_v23 = vld [vmem:[#allocation10 + $0x108] sm:$0xff] }
  0x78   :  { %721 = vmatpush3.bf16.msra.mxu1 %v720_v46  ;;  %v412_v46 = vld [vmem:[#allocation10 + $0x38] sm:$0xff]  ;;  %v437_v27 = vld [vmem:[#allocation10 + $0x100] sm:$0xff]  ;;  %v443_v34 = vld [vmem:[#allocation10 + $0x130] sm:$0xff] }
  0x79   :  { %722 = vmatprep.subr.bf16.mxu1 %v983_v0  ;;  %v731_v0 = vpack.c.bf16 %v294_v61, %v292_v60  ;;  %v417_v61 = vld [vmem:[#allocation10 + $0x60] sm:$0xff]  ;;  %v446_v35 = vld [vmem:[#allocation10 + $0x148] sm:$0xff]  ;;  %v447_v40 = vld [vmem:[#allocation10 + $0x150] sm:$0xff] }
  0x7a   :  { %700 = vmatpush3.bf16.msra.mxu0 %v699_v45  ;;  %v410_v45 = vld [vmem:[#allocation10 + $0x28] sm:$0xff] }
  0x7b   :  { %726 = vmatprep.subr.bf16.mxu0 %v725_v54  ;;  %v761_v48 = vpack.c.bf16 %v412_v46, %v410_v45  ;;  %v765_v54 = vpack.c.bf16 %v416_v52, %v414_v51  ;;  %v450_v41 = vld [vmem:[#allocation10 + $0x168] sm:$0xff]  ;;  %v449_v45 = vld [vmem:[#allocation10 + $0x160] sm:$0xff]  ;;  %v451_v46 = vld [vmem:[#allocation10 + $0x170] sm:$0xff] }
  0x7c   :  { %724 = vmatpush3.bf16.msra.mxu1 %v723_v50  ;;  %v411_v50 = vld [vmem:[#allocation10 + $0x30] sm:$0xff]  ;;  %v453_v51 = vld [vmem:[#allocation10 + $0x180] sm:$0xff] }
  0x7d   :  { %640 = vmatmul.mubr.f32.vlgmr.msra.gmra.mrb[0].mxu0 %v99_v47  ;;  %v759_v47 = vpack.c.bf16 %v407_v44, %v405_v42  ;;  %758 = vmatprep.subr.bf16.mxu1 %v757_v43  ;;  %v763_v53 = vpack.c.bf16 %v411_v50, %v409_v49  ;;  %v452_v42 = vld [vmem:[#allocation10 + $0x178] sm:$0xff]  ;;  %v803_v49 = vpack.c.bf16 %v451_v46, %v449_v45  ;;  %v455_v52 = vld [vmem:[#allocation10 + $0x190] sm:$0xff] }
  0x7e   :  { %396 = vmatprep.mubr.f32.mxu0 %v985_v1  ;;  %728 = vmatpush1.bf16.msra.mxu0 %v727_v58  ;;  %v733_v1 = vpack.c.bf16 %v299_v63, %v297_v62  ;;  %v420_v58 = vld [vmem:[#allocation10 + $0x78] sm:$0xff]  ;;  %v419_v62 = vld [vmem:[#allocation10 + $0x70] sm:$0xff]  ;;  %v422_v63 = vld [vmem:[#allocation10 + $0x88] sm:$0xff]  ;;  %v801_v44 = vpack.c.bf16 %v452_v42, %v450_v41 }
  0x7f   :  { %730 = vmatprep.subr.bf16.mxu0 %v729_v59  ;;  %v767_v59 = vpack.c.bf16 %v415_v56, %v413_v55  ;;  %v769_v60 = vpack.c.bf16 %v420_v58, %v418_v57  ;;  %v807_v55 = vpack.c.bf16 %v455_v52, %v453_v51  ;;  %v457_v57 = vld [vmem:[#allocation10 + $0x1a0] sm:$0xff]  ;;  %v459_v58 = vld [vmem:[#allocation10 + $0x1b0] sm:$0xff] }
  0x82   :  { %732 = vmatpush1.bf16.msra.mxu0 %v731_v0  ;;  %v424_v0 = vld [vmem:[#allocation10 + $0x98] sm:$0xff] }
  0x83   :  { %734 = vmatprep.subr.bf16.mxu0 %v733_v1  ;;  %v771_v1 = vpack.c.bf16 %v419_v62, %v417_v61  ;;  %v773_v2 = vpack.c.bf16 %v424_v0, %v422_v63  ;;  %v811_v61 = vpack.c.bf16 %v459_v58, %v457_v57  ;;  %v572_v63 = vld [vmem:[%s1163_s4] ss:$0 sm:$0xff] }
  0x86   :  { %736 = vmatpush1.bf16.msra.mxu0 %v735_v6  ;;  %v428_v6 = vld [vmem:[#allocation10 + $0xb8] sm:$0xff] }
  0x87   :  { %738 = vmatprep.subr.bf16.mxu0 %v737_v7  ;;  %v775_v7 = vpack.c.bf16 %v423_v4, %v421_v3  ;;  %v777_v8 = vpack.c.bf16 %v428_v6, %v426_v5  ;;  %v461_v4 = vld [vmem:[#allocation10 + $0x1c0] sm:$0xff]  ;;  %v463_v5 = vld [vmem:[#allocation10 + $0x1d0] sm:$0xff] }
  0x88   :  { %v815_v6 = vpack.c.bf16 %v463_v5, %v461_v4 }
  0x8a   :  { %740 = vmatpush1.bf16.msra.mxu0 %v739_v12  ;;  %v432_v12 = vld [vmem:[#allocation10 + $0xd8] sm:$0xff] }
  0x8b   :  { %742 = vmatprep.subr.bf16.mxu0 %v741_v13  ;;  %v779_v13 = vpack.c.bf16 %v427_v10, %v425_v9  ;;  %v781_v14 = vpack.c.bf16 %v432_v12, %v430_v11  ;;  %v465_v10 = vld [vmem:[#allocation10 + $0x1e0] sm:$0xff]  ;;  %v467_v11 = vld [vmem:[#allocation10 + $0x1f0] sm:$0xff] }
  0x8c   :  { %v819_v12 = vpack.c.bf16 %v467_v11, %v465_v10 }
  0x8e   :  { %744 = vmatpush1.bf16.msra.mxu0 %v743_v18  ;;  %v436_v18 = vld [vmem:[#allocation10 + $0xf8] sm:$0xff] }
  0x8f   :  { %746 = vmatprep.subr.bf16.mxu0 %v745_v19  ;;  %v783_v19 = vpack.c.bf16 %v431_v16, %v429_v15  ;;  %v785_v20 = vpack.c.bf16 %v436_v18, %v434_v17  ;;  %v320_v16 = vld [vmem:[%s1165_s6] sm:$0x3]  ;;  %s944_s6 = scalar_lea.vmem %s561_s13, 256 }
  0x90   :  { %p945_p12 = scmp.ne.s32.totalorder %s561_s13, %s944_s6  ;;  %p950_p0 = scmp.lt.s32.totalorder %s944_s6, %s944_s6 }
  0x92   :  { %748 = vmatpush1.bf16.msra.mxu0 %v747_v24  ;;  %v440_v24 = vld [vmem:[#allocation10 + $0x118] sm:$0xff]  ;;  %p951_p1 = por %p950_p0, %p949_p13 }
  0x93   :  { %750 = vmatprep.subr.bf16.mxu0 %v749_v25  ;;  %v787_v25 = vpack.c.bf16 %v435_v22, %v433_v21  ;;  %v789_v26 = vpack.c.bf16 %v440_v24, %v438_v23 }
  0x94   :  { %p952_p2 = pnand %p951_p1, %p945_p12 }
  0x96   :  { %752 = vmatpush1.bf16.msra.mxu0 %v751_v28  ;;  %v439_v28 = vld [vmem:[#allocation10 + $0x110] sm:$0xff] }
  0x97   :  { %754 = vmatprep.subr.bf16.mxu0 %v753_v36  ;;  %v448_v36 = vld [vmem:[#allocation10 + $0x158] sm:$0xff] }
  0x98   :  { %v797_v38 = vpack.c.bf16 %v448_v36, %v446_v35 }
  0x9a   :  { %756 = vmatpush1.bf16.msra.mxu0 %v755_v39  ;;  %v445_v39 = vld [vmem:[#allocation10 + $0x140] sm:$0xff] }
  0x9b   :  { %v799_v43 = vpack.c.bf16 %v447_v40, %v445_v39 }
 0x150   :  { %v189_v30 = vpop.f32.mrb[0].mxu0 }
 0x151   :  { %v190_v31 = vadd.f32 %v571_v29, %v189_v30  ;;  %v641_v32 = vpop.f32.mrb[1].mxu0  ;;  %v442_v29 = vld [vmem:[#allocation10 + $0x128] sm:$0xff]  ;;  %v444_v30 = vld [vmem:[#allocation10 + $0x138] sm:$0xff] }
 0x152   :  { %v793_v32 = vpack.c.bf16 %v444_v30, %v442_v29 }
 0x153   :  { %v193_v33 = vmax.f32 %v190_v31, 0.0  ;;  %v791_v31 = vpack.c.bf16 %v439_v28, %v437_v27 }
 0x155   :  { %675 = vmatmul.mubr.f32.vlgmr.msra.gmra.mrb[0].mxu1 %v193_v33  ;;  %v441_v33 = vld [vmem:[#allocation10 + $0x120] sm:$0xff] }
 0x156   :  { %760 = vmatpush1.bf16.msra.mxu1 %v759_v47  ;;  %v795_v37 = vpack.c.bf16 %v443_v34, %v441_v33  ;;  %v454_v47 = vld [vmem:[#allocation10 + $0x188] sm:$0xff] }
 0x157   :  { %762 = vmatprep.subr.bf16.mxu1 %v761_v48  ;;  %v456_v48 = vld [vmem:[#allocation10 + $0x198] sm:$0xff] }
 0x158   :  { %v805_v50 = vpack.c.bf16 %v456_v48, %v454_v47 }
 0x15a   :  { %764 = vmatpush1.bf16.msra.mxu1 %v763_v53  ;;  %v458_v53 = vld [vmem:[#allocation10 + $0x1a8] sm:$0xff] }
 0x15b   :  { %766 = vmatprep.subr.bf16.mxu1 %v765_v54  ;;  %v460_v54 = vld [vmem:[#allocation10 + $0x1b8] sm:$0xff] }
 0x15c   :  { %v809_v56 = vpack.c.bf16 %v460_v54, %v458_v53 }
 0x15e   :  { %768 = vmatpush1.bf16.msra.mxu1 %v767_v59  ;;  %v462_v59 = vld [vmem:[#allocation10 + $0x1c8] sm:$0xff] }
 0x15f   :  { %770 = vmatprep.subr.bf16.mxu1 %v769_v60  ;;  %v464_v60 = vld [vmem:[#allocation10 + $0x1d8] sm:$0xff] }
 0x160   :  { %v813_v62 = vpack.c.bf16 %v464_v60, %v462_v59 }
 0x162   :  { %772 = vmatpush1.bf16.msra.mxu1 %v771_v1 }
 0x163   :  { %774 = vmatprep.subr.bf16.mxu1 %v773_v2 }
 0x166   :  { %776 = vmatpush1.bf16.msra.mxu1 %v775_v7  ;;  %v466_v7 = vld [vmem:[#allocation10 + $0x1e8] sm:$0xff] }
 0x167   :  { %778 = vmatprep.subr.bf16.mxu1 %v777_v8  ;;  %v468_v8 = vld [vmem:[#allocation10 + $0x1f8] sm:$0xff] }
 0x168   :  { %v817_v9 = vpack.c.bf16 %v468_v8, %v466_v7 }
 0x16a   :  { %780 = vmatpush1.bf16.msra.mxu1 %v779_v13  ;;  %v322_v13 = vlaneseq }
 0x16b   :  { %782 = vmatprep.subr.bf16.mxu1 %v781_v14 }
 0x16c   :  { %v323_v14 = vshrl.u32 %v322_v13, 7 }
 0x16e   :  { %784 = vmatpush1.bf16.msra.mxu1 %v783_v19  ;;  %v324_v15 = vsub.s32 0, %v323_v14  ;;  %v328_v17 = vsub.s32 1, %v323_v14 }
 0x16f   :  { %786 = vmatprep.subr.bf16.mxu1 %v785_v20 }
 0x170   :  { %v325_v18 = vrot.slane %v320_v16, %v324_v15  ;;  %v329_v19 = vrot.slane %v320_v16, %v328_v17 }
 0x172   :  { %788 = vmatpush1.bf16.msra.mxu1 %v787_v25 }
 0x173   :  { %790 = vmatprep.subr.bf16.mxu1 %v789_v26  ;;  %v469_v26 = vld [vmem:[%s1167_s8] sm:$0x3] }
 0x174   :  { %v474_v27 = vrot.slane %v469_v26, %v324_v15  ;;  %v478_v28 = vrot.slane %v469_v26, %v328_v17 }
 0x176   :  { %792 = vmatpush1.bf16.msra.mxu1 %v791_v31 }
 0x177   :  { %794 = vmatprep.subr.bf16.mxu1 %v793_v32 }
 0x17a   :  { %796 = vmatpush1.bf16.msra.mxu1 %v795_v37 }
 0x17b   :  { %798 = vmatprep.subr.bf16.mxu1 %v797_v38 }
 0x17e   :  { %800 = vmatpush1.bf16.msra.mxu1 %v799_v43 }
 0x17f   :  { %802 = vmatprep.subr.bf16.mxu1 %v801_v44 }
 0x182   :  { %804 = vmatpush1.bf16.msra.mxu1 %v803_v49 }
 0x183   :  { %806 = vmatprep.subr.bf16.mxu1 %v805_v50 }
 0x186   :  { %808 = vmatpush1.bf16.msra.mxu1 %v807_v55 }
 0x187   :  { %810 = vmatprep.subr.bf16.mxu1 %v809_v56 }
 0x18a   :  { %812 = vmatpush1.bf16.msra.mxu1 %v811_v61 }
 0x18b   :  { %814 = vmatprep.subr.bf16.mxu1 %v813_v62 }
 0x18e   :  { %816 = vmatpush1.bf16.msra.mxu1 %v815_v6 }
 0x18f   :  { %818 = vmatprep.subr.bf16.mxu1 %v817_v9 }
 0x192   :  { %820 = vmatpush1.bf16.msra.mxu1 %v819_v12 }
 0x228   :  { %v283_v0 = vpop.f32.mrb[0].mxu1 }
 0x229   :  { %v284_v1 = vadd.f32 %v572_v63, %v283_v0  ;;  %v676_v2 = vpop.f32.mrb[1].mxu1 }
 0x22b   :  { %v287_v3 = vmax.f32 %v284_v1, 0.0 }
 0x22d   :  { %397 = vmatmul.mubr.f32.vlgmr.msra.gmra.mrb[2].mxu0 %v287_v3 }
 0x300   :  { %v398_v20 = vpop.f32.mrb[2].mxu0 }
 0x301   :  { %v399_v21 = vadd.f32 %v398_v20, %v325_v18  ;;  %v400_v22 = vpop.f32.mrb[3].mxu0 }
 0x302   :  { %v401_v23 = vadd.f32 %v400_v22, %v329_v19 }
 0x303   :  { %v403_v25 = vmax.f32 %v399_v21, 0.0 }
 0x304   :  { %v404_v24 = vmax.f32 %v401_v23, 0.0 }
 0x306   :  { %545 = vmatprep.mubr.f32.mxu1 %v404_v24 }
 0x307   :  { %546 = vmatmul.mubr.f32.vlgmr.msra.gmra.mrb[2].mxu1 %v403_v25 }
 0x3da   :  { %v547_v29 = vpop.f32.mrb[2].mxu1 }
 0x3db   :  { %v548_v30 = vadd.f32 %v547_v29, %v474_v27  ;;  %v549_v31 = vpop.f32.mrb[3].mxu1 }
 0x3dc   :  { %v550_v32 = vadd.f32 %v549_v31, %v478_v28 }
 0x3dd   :  { %552 = vst [vmem:[#allocation11] sm:$0xff] %v548_v30 }
 0x3de   :  { %553 = vst [vmem:[#allocation11 + $0x8] sm:$0xff] %v550_v32 }
 0x3df   :  { %955 = shalt.err (!%p952_p2)
}
 0x3e0   :  { %s956_s15 = scalar_lea.hbm %s1168_s9, 256 }
 0x3e1   :  { %p957_p3 = scmp.ne.s32.totalorder %s1168_s9, %s956_s15  ;;  %p960_p4 = scmp.lt.u32.totalorder %s956_s15, %s1168_s9 }
 0x3e3   :  { %p962_p5 = pnand %p960_p4, %p957_p3 }
 0x3e5   :  { %965 = shalt.err (!%p962_p5)
}
 0x3e6   :  { %563 = dma.vmem_to_hbm [thread:$0]  %s561_s13, 256, %s1168_s9, [#allocation4]  }
 0x3e7   :  { %972 = dma.done.wait [#allocation4], 256  }
 0x3e8   :  { %973 = vsyncadd [#allocation4], 4294967040 }
 0x3e9   :  { %567 = vsyncpa [#allocation3], 1 }
 0x3ea   :  { %568 = vsyncpa [#allocation6], 1 }
 0x3eb   :  { %569 = vsyncpa [#allocation9], 1 }
 0x3ec   :  { %570 = vsyncpa [#allocation4], 1 }

</bundles_post_ra>
